<compile_context>
chip_gen: v7x
topology: tpu7x:2x2x1
jax: 0.10.0
libtpu: 0.0.40
codegen_flags: <defaults>
</compile_context>

<pallas_src>
import functools

import jax
import jax.numpy as jnp
from jax import lax
from jax.experimental import pallas as pl
from jax.experimental.pallas import tpu as pltpu

# dot_general dimension numbers (same constants as the TPU flash-attention op).
_NN = (((1,), (0,)), ((), ()))   # standard matmul
_NT = (((1,), (1,)), ((), ()))   # rhs transposed  (A @ B^T)
_TN = (((0,), (0,)), ((), ()))   # lhs transposed  (A^T @ B)


def _make_fcnn_kernel(n_parts):
    def kernel(*refs):
        x_refs = refs[:n_parts]
        w1_refs = refs[n_parts:2 * n_parts]
        b1_ref, w2_ref, b2_ref, w3t_ref, b3_ref, y_ref = refs[2 * n_parts:]

        # Layer 1: z1[h, t] = sum_i W1_i[h, :] . X_i[t, :]
        # NT dot keeps the input in its natural HBM layout while putting the
        # batch on the 128 lanes for the hidden-layer compute.
        z1 = lax.dot_general(w1_refs[0][...], x_refs[0][...], _NT,
                             preferred_element_type=jnp.float32)
        for w_r, x_r in zip(w1_refs[1:], x_refs[1:]):
            z1 = z1 + lax.dot_general(w_r[...], x_r[...], _NT,
                                      preferred_element_type=jnp.float32)
        h1 = jnp.tanh(z1 + b1_ref[...])                         # (H, tile)

        # Layer 2: standard NN dot, batch stays on lanes (full-width tanh).
        h2 = jnp.tanh(
            lax.dot_general(w2_ref[...], h1, _NN,
                            preferred_element_type=jnp.float32)
            + b2_ref[...])                                      # (H, tile)

        # Layer 3: TN dot folds the layout back to natural (tile, d_out), so no
        # separate XLA transpose pass is needed on the output.
        y = lax.dot_general(h2, w3t_ref[...], _TN,
                            preferred_element_type=jnp.float32)  # (tile, d_out)
        y_ref[...] = y + b3_ref[...]

    return kernel


def _pick_tile(m, tile_m):
    """Lane-aligned batch tile; >=2 grid steps for medium/large batches (v7x)."""
    tile_m = max(128, (int(tile_m) // 128) * 128)
    if m <= 256:
        # Single full-extent block (block dims == array dims, no padding needed).
        return m, 1
    tile = min(tile_m, ((m // 2 + 127) // 128) * 128)   # keep >= 2 grid steps
    tile = max(128, min(tile, m))
    return tile, pl.cdiv(m, tile)


@functools.partial(jax.jit, static_argnames=("tile_m",))
def _fcnn_pallas(parts, w1_parts, b1, w2, b2, w3, b3, *, tile_m=8192):
    m = parts[0].shape[0]
    dims = [p.shape[1] for p in parts]
    in_total = sum(dims)
    hidden = w2.shape[0]
    d_out = w3.shape[0]

    tile, grid_m = _pick_tile(m, tile_m)

    # Tiny, weight-sized relayouts (negligible; fused/const-folded under jit).
    b1c = b1.reshape(hidden, 1)
    b2c = b2.reshape(hidden, 1)
    w3t = w3.T                                   # (hidden, d_out) for the TN dot
    b3r = b3.reshape(1, d_out)

    x_specs = [pl.BlockSpec((tile, d), lambda i: (i, 0)) for d in dims]
    w1_specs = [pl.BlockSpec((hidden, d), lambda i: (0, 0)) for d in dims]
    const = lambda shape: pl.BlockSpec(shape, lambda i: (0, 0))

    # Advisory cost + VMEM sizing (double-buffered blocks + intermediates).
    flops = 2 * m * (in_total * hidden + hidden * hidden + hidden * d_out)
    transcendentals = 2 * m * hidden
    bytes_accessed = 4 * (m * (in_total + d_out)
                          + hidden * (in_total + hidden + d_out)
                          + 2 * hidden + d_out)
    est_vmem = 4 * (2 * tile * (in_total + d_out) + 4 * tile * hidden
                    + 2 * (hidden * (in_total + hidden + d_out)
                           + 2 * hidden + d_out))
    vmem_limit = int(min(max(3 * est_vmem, 32 << 20), 64 << 20))

    kernel = _make_fcnn_kernel(len(parts))

    return pl.pallas_call(
        kernel,
        out_shape=jax.ShapeDtypeStruct((m, d_out), jnp.float32),
        grid=(grid_m,),
        in_specs=x_specs + w1_specs + [
            const((hidden, 1)),        # b1
            const((hidden, hidden)),   # w2
            const((hidden, 1)),        # b2
            const((hidden, d_out)),    # w3^T
            const((1, d_out)),         # b3
        ],
        out_specs=pl.BlockSpec((tile, d_out), lambda i: (i, 0)),
        compiler_params=pltpu.CompilerParams(
            dimension_semantics=("parallel",),
            vmem_limit_bytes=vmem_limit),
        cost_estimate=pl.CostEstimate(flops=flops,
                                      transcendentals=transcendentals,
                                      bytes_accessed=bytes_accessed),
    )(*parts, *w1_parts, b1c, w2, b2c, w3t, b3r)


def fcnn_forward(x, additional_inputs, w1, b1, w2, b2, w3, b3, *, tile_m=8192):
    """Matches FCNN.forward(x, additional_inputs) with PyTorch Linear params.

    w*: (out_features, in_features), b*: (out_features,)  (PyTorch layout).
    additional_inputs: list of arrays to concat on the last dim, or None.
    The concat never materialises: each input is a separate kernel operand and
    w1 is split column-wise to match.
    """
    adds = list(additional_inputs) if additional_inputs is not None else []
    parts = [x] + adds
    lead = x.shape[:-1]

    parts2d = [p.reshape(-1, p.shape[-1]) for p in parts]
    dims = [p.shape[-1] for p in parts2d]
    offs = [0]
    for d in dims:
        offs.append(offs[-1] + d)
    w1_parts = [w1[:, offs[i]:offs[i + 1]] for i in range(len(dims))]

    y = _fcnn_pallas(tuple(parts2d), tuple(w1_parts), b1, w2, b2, w3, b3,
                     tile_m=tile_m)
    return y.reshape(*lead, w3.shape[0])


def _reference_forward(x, additional_inputs, w1, b1, w2, b2, w3, b3):
    inp = (jnp.concatenate([x] + list(additional_inputs), axis=-1)
           if additional_inputs is not None else x)
    h = jnp.tanh(inp @ w1.T + b1)
    h = jnp.tanh(h @ w2.T + b2)
    return h @ w3.T + b3


if __name__ == "__main__":
    IN_DIM, ADD1, ADD2 = 8, 8, 4
    HIDDEN, OUT_DIM = 32, 16
    BATCH = 300          # >256 -> two grid steps, incl. one ragged partial block

    key = jax.random.PRNGKey(0)
    kx, ka1, ka2, k1, kb1, k2, kb2, k3, kb3 = jax.random.split(key, 9)

    x = jax.random.normal(kx, (BATCH, IN_DIM), jnp.float32)
    a1 = jax.random.normal(ka1, (BATCH, ADD1), jnp.float32)
    a2 = jax.random.normal(ka2, (BATCH, ADD2), jnp.float32)

    in_total = IN_DIM + ADD1 + ADD2
    # PyTorch-layout Linear parameters: weight (out, in), bias (out,).
    w1 = 0.2 * jax.random.normal(k1, (HIDDEN, in_total), jnp.float32)
    b1 = 0.05 * jax.random.normal(kb1, (HIDDEN,), jnp.float32)
    w2 = 0.2 * jax.random.normal(k2, (HIDDEN, HIDDEN), jnp.float32)
    b2 = 0.05 * jax.random.normal(kb2, (HIDDEN,), jnp.float32)
    w3 = 0.2 * jax.random.normal(k3, (OUT_DIM, HIDDEN), jnp.float32)
    b3 = 0.05 * jax.random.normal(kb3, (OUT_DIM,), jnp.float32)

    # Multi-part path (additional_inputs list) with a ragged batch.
    y = fcnn_forward(x, [a1, a2], w1, b1, w2, b2, w3, b3)
    jax.block_until_ready(y)
    y_ref = _reference_forward(x, [a1, a2], w1, b1, w2, b2, w3, b3)
    assert y.shape == (BATCH, OUT_DIM), f"bad output shape {y.shape}"
    assert jnp.allclose(y, y_ref, atol=1e-3, rtol=1e-3), "FCNN output mismatch"

    # additional_inputs=None path, small batch -> single full-extent block.
    y2 = fcnn_forward(x[:100], None, w1[:, :IN_DIM], b1, w2, b2, w3, b3)
    jax.block_until_ready(y2)
    y2_ref = _reference_forward(x[:100], None, w1[:, :IN_DIM], b1, w2, b2, w3, b3)
    assert y2.shape == (100, OUT_DIM)
    assert jnp.allclose(y2, y2_ref, atol=1e-3, rtol=1e-3), "None-path mismatch"

    print("KERNEL_OK")
</pallas_src>

<mosaic_0001>
module attributes {stable_mosaic.version = 11 : i64} {
  func.func @kernel(%arg0: i32, %arg1: memref<256x8xf32, #tpu.memory_space<vmem>>, %arg2: memref<256x8xf32, #tpu.memory_space<vmem>>, %arg3: memref<256x4xf32, #tpu.memory_space<vmem>>, %arg4: memref<32x8xf32, #tpu.memory_space<vmem>>, %arg5: memref<32x8xf32, #tpu.memory_space<vmem>>, %arg6: memref<32x4xf32, #tpu.memory_space<vmem>>, %arg7: memref<32x1xf32, #tpu.memory_space<vmem>>, %arg8: memref<32x32xf32, #tpu.memory_space<vmem>>, %arg9: memref<32x1xf32, #tpu.memory_space<vmem>>, %arg10: memref<32x16xf32, #tpu.memory_space<vmem>>, %arg11: memref<1x16xf32, #tpu.memory_space<vmem>>, %arg12: memref<256x16xf32, #tpu.memory_space<vmem>>) attributes {dimension_semantics = [#tpu.dimension_semantics<parallel>], iteration_bounds = array<i64: 2>, scalar_prefetch = 0 : i64, scratch_operands = 0 : i64, tpu.core_type = #tpu.core_type<tc>, window_params = [{transform_indices = @transform_0, window_bounds = array<i64: 256, 8>}, {transform_indices = @transform_1, window_bounds = array<i64: 256, 8>}, {transform_indices = @transform_2, window_bounds = array<i64: 256, 4>}, {pipeline_mode = #tpu.pipeline_mode<synchronous>, transform_indices = @transform_3, window_bounds = array<i64: 32, 8>}, {pipeline_mode = #tpu.pipeline_mode<synchronous>, transform_indices = @transform_4, window_bounds = array<i64: 32, 8>}, {pipeline_mode = #tpu.pipeline_mode<synchronous>, transform_indices = @transform_5, window_bounds = array<i64: 32, 4>}, {pipeline_mode = #tpu.pipeline_mode<synchronous>, transform_indices = @transform_6, window_bounds = array<i64: 32, 1>}, {pipeline_mode = #tpu.pipeline_mode<synchronous>, transform_indices = @transform_7, window_bounds = array<i64: 32, 32>}, {pipeline_mode = #tpu.pipeline_mode<synchronous>, transform_indices = @transform_8, window_bounds = array<i64: 32, 1>}, {pipeline_mode = #tpu.pipeline_mode<synchronous>, transform_indices = @transform_9, window_bounds = array<i64: 32, 16>}, {pipeline_mode = #tpu.pipeline_mode<synchronous>, transform_indices = @transform_10, window_bounds = array<i64: 1, 16>}, {transform_indices = @transform_11, window_bounds = array<i64: 256, 16>}]} {
    %c0 = arith.constant 0 : index
    %c0_0 = arith.constant 0 : index
    %0 = vector.load %arg4[%c0, %c0_0] : memref<32x8xf32, #tpu.memory_space<vmem>>, vector<32x8xf32>
    %c0_1 = arith.constant 0 : index
    %c0_2 = arith.constant 0 : index
    %1 = vector.load %arg1[%c0_1, %c0_2] : memref<256x8xf32, #tpu.memory_space<vmem>>, vector<256x8xf32>
    %cst = arith.constant dense<0.000000e+00> : vector<32x256xf32>
    %2 = tpu.matmul %0, %1, %cst {dimension_numbers = #tpu.dot_dimension_numbers<[1], [1], [0], [0], [0, 0, 1, 0], [], []>} : vector<32x8xf32>, vector<256x8xf32>, vector<32x256xf32> -> vector<32x256xf32>
    %c0_3 = arith.constant 0 : index
    %c0_4 = arith.constant 0 : index
    %3 = vector.load %arg5[%c0_3, %c0_4] : memref<32x8xf32, #tpu.memory_space<vmem>>, vector<32x8xf32>
    %c0_5 = arith.constant 0 : index
    %c0_6 = arith.constant 0 : index
    %4 = vector.load %arg2[%c0_5, %c0_6] : memref<256x8xf32, #tpu.memory_space<vmem>>, vector<256x8xf32>
    %cst_7 = arith.constant dense<0.000000e+00> : vector<32x256xf32>
    %5 = tpu.matmul %3, %4, %cst_7 {dimension_numbers = #tpu.dot_dimension_numbers<[1], [1], [0], [0], [0, 0, 1, 0], [], []>} : vector<32x8xf32>, vector<256x8xf32>, vector<32x256xf32> -> vector<32x256xf32>
    %6 = arith.addf %2, %5 : vector<32x256xf32>
    %c0_8 = arith.constant 0 : index
    %c0_9 = arith.constant 0 : index
    %7 = vector.load %arg6[%c0_8, %c0_9] : memref<32x4xf32, #tpu.memory_space<vmem>>, vector<32x4xf32>
    %c0_10 = arith.constant 0 : index
    %c0_11 = arith.constant 0 : index
    %8 = vector.load %arg3[%c0_10, %c0_11] : memref<256x4xf32, #tpu.memory_space<vmem>>, vector<256x4xf32>
    %cst_12 = arith.constant dense<0.000000e+00> : vector<32x256xf32>
    %9 = tpu.matmul %7, %8, %cst_12 {dimension_numbers = #tpu.dot_dimension_numbers<[1], [1], [0], [0], [0, 0, 1, 0], [], []>} : vector<32x4xf32>, vector<256x4xf32>, vector<32x256xf32> -> vector<32x256xf32>
    %10 = arith.addf %6, %9 : vector<32x256xf32>
    %c0_13 = arith.constant 0 : index
    %c0_14 = arith.constant 0 : index
    %11 = vector.load %arg7[%c0_13, %c0_14] : memref<32x1xf32, #tpu.memory_space<vmem>>, vector<32x1xf32>
    %12 = vector.broadcast %11 : vector<32x1xf32> to vector<32x256xf32>
    %13 = arith.addf %10, %12 : vector<32x256xf32>
    %14 = math.tanh %13 : vector<32x256xf32>
    %c0_15 = arith.constant 0 : index
    %c0_16 = arith.constant 0 : index
    %15 = vector.load %arg8[%c0_15, %c0_16] : memref<32x32xf32, #tpu.memory_space<vmem>>, vector<32x32xf32>
    %cst_17 = arith.constant dense<0.000000e+00> : vector<32x256xf32>
    %16 = tpu.matmul %15, %14, %cst_17 {dimension_numbers = #tpu.dot_dimension_numbers<[1], [0], [0], [1], [0, 0, 1, 1], [], []>} : vector<32x32xf32>, vector<32x256xf32>, vector<32x256xf32> -> vector<32x256xf32>
    %c0_18 = arith.constant 0 : index
    %c0_19 = arith.constant 0 : index
    %17 = vector.load %arg9[%c0_18, %c0_19] : memref<32x1xf32, #tpu.memory_space<vmem>>, vector<32x1xf32>
    %18 = vector.broadcast %17 : vector<32x1xf32> to vector<32x256xf32>
    %19 = arith.addf %16, %18 : vector<32x256xf32>
    %20 = math.tanh %19 : vector<32x256xf32>
    %c0_20 = arith.constant 0 : index
    %c0_21 = arith.constant 0 : index
    %21 = vector.load %arg10[%c0_20, %c0_21] : memref<32x16xf32, #tpu.memory_space<vmem>>, vector<32x16xf32>
    %cst_22 = arith.constant dense<0.000000e+00> : vector<256x16xf32>
    %22 = tpu.matmul %20, %21, %cst_22 {dimension_numbers = #tpu.dot_dimension_numbers<[0], [0], [1], [1], [0, 1, 1, 1], [], []>} : vector<32x256xf32>, vector<32x16xf32>, vector<256x16xf32> -> vector<256x16xf32>
    %c0_23 = arith.constant 0 : index
    %c0_24 = arith.constant 0 : index
    %23 = vector.load %arg11[%c0_23, %c0_24] : memref<1x16xf32, #tpu.memory_space<vmem>>, vector<1x16xf32>
    %24 = vector.broadcast %23 : vector<1x16xf32> to vector<256x16xf32>
    %25 = arith.addf %22, %24 : vector<256x16xf32>
    %c0_25 = arith.constant 0 : index
    %c0_26 = arith.constant 0 : index
    %26 = vector.load %arg12[%c0_25, %c0_26] : memref<256x16xf32, #tpu.memory_space<vmem>>, vector<256x16xf32>
    tpu.vector_store %arg12[%c0_25, %c0_26], %25 {strides = array<i32>} : memref<256x16xf32, #tpu.memory_space<vmem>>, vector<256x16xf32>,
    return
  }
  func.func @transform_0(%arg0: i32) -> (i32, i32) {
    %c0_i32 = arith.constant 0 : i32
    %c0_i32_0 = arith.constant 0 : i32
    return %arg0, %c0_i32 : i32, i32
  }
  func.func @transform_1(%arg0: i32) -> (i32, i32) {
    %c0_i32 = arith.constant 0 : i32
    %c0_i32_0 = arith.constant 0 : i32
    return %arg0, %c0_i32 : i32, i32
  }
  func.func @transform_2(%arg0: i32) -> (i32, i32) {
    %c0_i32 = arith.constant 0 : i32
    %c0_i32_0 = arith.constant 0 : i32
    return %arg0, %c0_i32 : i32, i32
  }
  func.func @transform_3(%arg0: i32) -> (i32, i32) {
    %c0_i32 = arith.constant 0 : i32
    %c0_i32_0 = arith.constant 0 : i32
    %c0_i32_1 = arith.constant 0 : i32
    return %c0_i32, %c0_i32_0 : i32, i32
  }
  func.func @transform_4(%arg0: i32) -> (i32, i32) {
    %c0_i32 = arith.constant 0 : i32
    %c0_i32_0 = arith.constant 0 : i32
    %c0_i32_1 = arith.constant 0 : i32
    return %c0_i32, %c0_i32_0 : i32, i32
  }
  func.func @transform_5(%arg0: i32) -> (i32, i32) {
    %c0_i32 = arith.constant 0 : i32
    %c0_i32_0 = arith.constant 0 : i32
    %c0_i32_1 = arith.constant 0 : i32
    return %c0_i32, %c0_i32_0 : i32, i32
  }
  func.func @transform_6(%arg0: i32) -> (i32, i32) {
    %c0_i32 = arith.constant 0 : i32
    %c0_i32_0 = arith.constant 0 : i32
    %c0_i32_1 = arith.constant 0 : i32
    return %c0_i32, %c0_i32_0 : i32, i32
  }
  func.func @transform_7(%arg0: i32) -> (i32, i32) {
    %c0_i32 = arith.constant 0 : i32
    %c0_i32_0 = arith.constant 0 : i32
    %c0_i32_1 = arith.constant 0 : i32
    return %c0_i32, %c0_i32_0 : i32, i32
  }
  func.func @transform_8(%arg0: i32) -> (i32, i32) {
    %c0_i32 = arith.constant 0 : i32
    %c0_i32_0 = arith.constant 0 : i32
    %c0_i32_1 = arith.constant 0 : i32
    return %c0_i32, %c0_i32_0 : i32, i32
  }
  func.func @transform_9(%arg0: i32) -> (i32, i32) {
    %c0_i32 = arith.constant 0 : i32
    %c0_i32_0 = arith.constant 0 : i32
    %c0_i32_1 = arith.constant 0 : i32
    return %c0_i32, %c0_i32_0 : i32, i32
  }
  func.func @transform_10(%arg0: i32) -> (i32, i32) {
    %c0_i32 = arith.constant 0 : i32
    %c0_i32_0 = arith.constant 0 : i32
    %c0_i32_1 = arith.constant 0 : i32
    return %c0_i32, %c0_i32_0 : i32, i32
  }
  func.func @transform_11(%arg0: i32) -> (i32, i32) {
    %c0_i32 = arith.constant 0 : i32
    %c0_i32_0 = arith.constant 0 : i32
    return %arg0, %c0_i32 : i32, i32
  }
}

</mosaic_0001>

<bundles_post_ra>
// kernel: _fcnn_pallas.1
= control target key start
LH: loop header
LB: loop body
LE: loop exit
PB: predicated region body
PF: predicated region fallthrough
CT: control target
= control target key end

     0   :  { %s3013_s17 = smov 0   ;;  %s3015_s18 = smov 0   ;;  %s3670_s0 = inlined_call_operand.vmem [shape: f32[300,8], index: 0, kind: input, shape index: {}]   ;;  %s3671_s1 = inlined_call_operand.vmem [shape: f32[300,8], index: 1, kind: input, shape index: {}]   ;;  %s3672_s2 = inlined_call_operand.vmem [shape: f32[300,4], index: 2, kind: input, shape index: {}]   ;;  %s3673_s3 = inlined_call_operand.vmem [shape: f32[32,8], index: 3, kind: input, shape index: {}]   ;;  %s3674_s4 = inlined_call_operand.vmem [shape: f32[32,8], index: 4, kind: input, shape index: {}]   ;;  %s3675_s5 = inlined_call_operand.vmem [shape: f32[32,4], index: 5, kind: input, shape index: {}]   ;;  %s3676_s6 = inlined_call_operand.vmem [shape: f32[32,1], index: 6, kind: input, shape index: {}]   ;;  %s3677_s7 = inlined_call_operand.vmem [shape: f32[32,32], index: 7, kind: input, shape index: {}]   ;;  %s3678_s8 = inlined_call_operand.vmem [shape: f32[32,1], index: 8, kind: input, shape index: {}]   ;;  %s3679_s9 = inlined_call_operand.vmem [shape: f32[32,16], index: 9, kind: input, shape index: {}]   ;;  %s3680_s10 = inlined_call_operand.vmem [shape: f32[1,16], index: 10, kind: input, shape index: {}]   ;;  %s3681_s11 = inlined_call_operand.vmem [shape: f32[300,16], index: 11, kind: output, shape index: {}]  }
   0x1   :  { %s3017_s19 = smov 0  }
   0x2 LB: > { %s3026_s20 = sadd.s32 4294967295, %s2917_s19   ;;  %s3028_s21 = sadd.s32 1, %s2917_s19   ;;  %s2917_s19 = sphi %s3017_s19, %s3694_s19   ;;  %s2913_s18 = sphi %s3015_s18, %s3693_s18   ;;  %s2909_s17 = sphi %s3013_s17, %s3692_s17  }
   0x3   : > { %s271_s22 = ssub.s32 %s2917_s19, %s3028_s21  ;;  %s274_s23 = sadd.s32 1, %s2913_s18 }
   0x4   : > { %p272_p0 = scmp.eq.s32.totalorder %s271_s22, 0  ;;  %p284_p1 = scmp.ne.s32.totalorder %s2913_s18, %s2909_s17 }
   0x5   : > { %p285_p2 = scmp.eq.s32.totalorder %s3026_s20, 1  ;;  %p2174_p3 = scmp.ge.s32.totalorder %s2917_s19, 1 }
   0x6   : > { %s3036_s24 = scalar_select %p272_p0, %s2913_s18, %s274_s23  }
   0x7   : > { %p3038_p4 = por %p285_p2, %p284_p1  ;;  %p384_p5 = scmp.lt.s32.totalorder %s2917_s19, 3 }
   0x9   : > { %p385_p6 = pnand %p2174_p3, %p384_p5 }
   0xa   : > { %s3043_s26 = sshll.u32 (!%p385_p6), %s3026_s20, 5  ;;  %vm564_vm0 = vcmask (!%p385_p6), 64512   ;;  %v3048_v0 = vld [vmem:[%s3673_s3] sm:$0xff] (!%p385_p6)  ;;  %v2951_v34 = vmov (!%p385_p6), 0   ;;  %v1203_v63 = vld [vmem:[%s3676_s6 + $0x10] sm:$0xff] (!%p385_p6)  ;;  %vm995_vm2 = vcmask (!%p385_p6), 31744  }
   0xb   : > { %388 = sbr.rel (%p385_p6) target bundleno = 1117 (0x45d), region = 64  ;;  %p450_p7 = scmp.lt.s32.totalorder (!%p385_p6), %s3043_s26, 37  ;;  %2419 = vmatprep.mubr.msk.f32.mxu0 (!%p385_p6), %vm564_vm0, %v3048_v0  ;;  %v3057_v1 = vld [vmem:[%s3674_s4] sm:$0xff] (!%p385_p6)  ;;  %vm3071_vm1 = vmpackc.low (!%p385_p6), %vm564_vm0, %vm564_vm0  ;;  %2829 = vset.pattern.permute.xlu0 (!%p385_p6), %v2951_v34  ;;  %v529_v2 = vld [vmem:[%s3674_s4 + $0x8] sm:$0xff] (!%p385_p6)  ;;  %vm1269_vm4 = vcmask (!%p385_p6), 261120   ;;  %vm1775_vm5 = vcmask (!%p385_p6), 130048  }
   0xc   : > { %2379 = vmatprep.mubr.msk.f32.mxu1 (!%p385_p6), %vm564_vm0, %v3057_v1  ;;  %2830 = vset.pattern.permute.xlu1 (!%p385_p6), %v2951_v34  ;;  %v1201_v62 = vld [vmem:[%s3676_s6] sm:$0xff] (!%p385_p6)  ;;  %vm3233_vm3 = vmpackc.low (!%p385_p6), %vm995_vm2, %vm995_vm2 }
   0xd   : > { %1207 = vperm.xlu0 (!%p385_p6), %2829, %v1201_v62   ;;  %1217 = vperm.xlu1 (!%p385_p6), %2830, %v1203_v63  }
  0x12   : > { %s451_s29 = scalar_select %p450_p7, %s3043_s26, 37 }
  0x13   : > { %s2344_s12 = sshll.u32 (%p3038_p4), %s3026_s20, 8 }
  0x14   : > { %s3061_s13 = sshll.u32 %s451_s29, 3  ;;  %s3538_s15 = scalar_lea.vmem (%p3038_p4), %s3681_s11, %s2344_s12  }
  0x15   : > { %s3067_s16 = scalar_lea.vmem %s3670_s0, %s3061_s13  ;;  %s3095_s23 = scalar_lea.vmem %s3671_s1, %s3061_s13 }
  0x16   : > { %v512_v3 = vld [vmem:[%s3067_s16 + $0x80] sm:$0xff]  ;;  %v513_v4 = vld [vmem:[%s3067_s16 + $0x88] sm:$0xff]  ;;  %v514_v8 = vld [vmem:[%s3067_s16 + $0x90] sm:$0xff]  ;;  %s3213_s27 = scalar_lea.vmem %s3672_s2, %s3061_s13 }
  0x17   : > { %v496_v5 = vld [vmem:[%s3067_s16] sm:$0xff]  ;;  %v2607_v6 = vpack.c.bf16 %v513_v4, %v512_v3  ;;  %v497_v7 = vld [vmem:[%s3067_s16 + $0x8] sm:$0xff]  ;;  %v515_v9 = vld [vmem:[%s3067_s16 + $0x98] sm:$0xff] }
  0x18   : > { %v2610_v10 = vpack.c.bf16 %v497_v7, %v496_v5  ;;  %v2613_v11 = vpack.c.bf16 %v515_v9, %v514_v8  ;;  %v498_v12 = vld [vmem:[%s3067_s16 + $0x10] sm:$0xff]  ;;  %v499_v13 = vld [vmem:[%s3067_s16 + $0x18] sm:$0xff]  ;;  %v516_v14 = vld [vmem:[%s3067_s16 + $0xa0] sm:$0xff] }
  0x19   : > { %2609 = vmatprep.subr.msk.bf16.mxu0 %vm3071_vm1, %v2607_v6  ;;  %v517_v15 = vld [vmem:[%s3067_s16 + $0xa8] sm:$0xff]  ;;  %v2616_v16 = vpack.c.bf16 %v499_v13, %v498_v12  ;;  %v548_v18 = vld [vmem:[%s3095_s23 + $0x80] sm:$0xff]  ;;  %v550_v26 = vld [vmem:[%s3095_s23 + $0x90] sm:$0xff] }
  0x1a   : > { %2612 = vmatpush3.bf16.xpose.msk.msra.mxu0 %vm3071_vm1, %v2610_v10  ;;  %v2619_v17 = vpack.c.bf16 %v517_v15, %v516_v14  ;;  %v549_v19 = vld [vmem:[%s3095_s23 + $0x88] sm:$0xff]  ;;  %v532_v20 = vld [vmem:[%s3095_s23] sm:$0xff]  ;;  %v551_v27 = vld [vmem:[%s3095_s23 + $0x98] sm:$0xff] }
  0x1b   : > { %2615 = vmatprep.subr.msk.bf16.mxu0 %vm3071_vm1, %v2613_v11  ;;  %v533_v21 = vld [vmem:[%s3095_s23 + $0x8] sm:$0xff]  ;;  %v500_v22 = vld [vmem:[%s3067_s16 + $0x20] sm:$0xff]  ;;  %v2559_v23 = vpack.c.bf16 %v549_v19, %v548_v18  ;;  %v518_v28 = vld [vmem:[%s3067_s16 + $0xb0] sm:$0xff]  ;;  %v2565_v30 = vpack.c.bf16 %v551_v27, %v550_v26 }
  0x1c   : > { %v2562_v24 = vpack.c.bf16 %v533_v21, %v532_v20  ;;  %v501_v25 = vld [vmem:[%s3067_s16 + $0x28] sm:$0xff]  ;;  %v519_v29 = vld [vmem:[%s3067_s16 + $0xb8] sm:$0xff]  ;;  %v534_v32 = vld [vmem:[%s3095_s23 + $0x10] sm:$0xff] }
  0x1d   : > { %2561 = vmatprep.subr.msk.bf16.mxu1 %vm3071_vm1, %v2559_v23  ;;  %v2622_v31 = vpack.c.bf16 %v501_v25, %v500_v22  ;;  %v535_v33 = vld [vmem:[%s3095_s23 + $0x18] sm:$0xff]  ;;  %v2625_v35 = vpack.c.bf16 %v519_v29, %v518_v28  ;;  %v552_v36 = vld [vmem:[%s3095_s23 + $0xa0] sm:$0xff]  ;;  %v553_v37 = vld [vmem:[%s3095_s23 + $0xa8] sm:$0xff] }
  0x1e   : > { %2564 = vmatpush3.bf16.xpose.msk.msra.mxu1 %vm3071_vm1, %v2562_v24  ;;  %v2568_v38 = vpack.c.bf16 %v535_v33, %v534_v32  ;;  %v2571_v39 = vpack.c.bf16 %v553_v37, %v552_v36  ;;  %v502_v40 = vld [vmem:[%s3067_s16 + $0x30] sm:$0xff]  ;;  %v503_v41 = vld [vmem:[%s3067_s16 + $0x38] sm:$0xff]  ;;  %v520_v42 = vld [vmem:[%s3067_s16 + $0xc0] sm:$0xff] }
  0x1f   : > { %2567 = vmatprep.subr.msk.bf16.mxu1 %vm3071_vm1, %v2565_v30  ;;  %v521_v43 = vld [vmem:[%s3067_s16 + $0xc8] sm:$0xff]  ;;  %v2628_v44 = vpack.c.bf16 %v503_v41, %v502_v40  ;;  %v536_v45 = vld [vmem:[%s3095_s23 + $0x20] sm:$0xff]  ;;  %v554_v48 = vld [vmem:[%s3095_s23 + $0xb0] sm:$0xff] }
  0x20   : > { %v537_v46 = vld [vmem:[%s3095_s23 + $0x28] sm:$0xff]  ;;  %v2631_v47 = vpack.c.bf16 %v521_v43, %v520_v42  ;;  %v555_v49 = vld [vmem:[%s3095_s23 + $0xb8] sm:$0xff]  ;;  %v504_v52 = vld [vmem:[%s3067_s16 + $0x40] sm:$0xff] }
  0x21   : > { %v2574_v50 = vpack.c.bf16 %v537_v46, %v536_v45  ;;  %v2577_v51 = vpack.c.bf16 %v555_v49, %v554_v48  ;;  %v505_v53 = vld [vmem:[%s3067_s16 + $0x48] sm:$0xff]  ;;  %v522_v54 = vld [vmem:[%s3067_s16 + $0xd0] sm:$0xff]  ;;  %v523_v55 = vld [vmem:[%s3067_s16 + $0xd8] sm:$0xff] }
  0x22   : > { %2618 = vmatpush3.bf16.xpose.msk.msra.mxu0 %vm3071_vm1, %v2616_v16  ;;  %v2634_v56 = vpack.c.bf16 %v505_v53, %v504_v52  ;;  %v538_v57 = vld [vmem:[%s3095_s23 + $0x30] sm:$0xff]  ;;  %v539_v58 = vld [vmem:[%s3095_s23 + $0x38] sm:$0xff]  ;;  %v2637_v59 = vpack.c.bf16 %v523_v55, %v522_v54  ;;  %v556_v60 = vld [vmem:[%s3095_s23 + $0xc0] sm:$0xff] }
  0x23   : > { %2621 = vmatprep.subr.msk.bf16.mxu0 %vm3071_vm1, %v2619_v17  ;;  %v557_v61 = vld [vmem:[%s3095_s23 + $0xc8] sm:$0xff]  ;;  %v2580_v3 = vpack.c.bf16 %v539_v58, %v538_v57  ;;  %v506_v6 = vld [vmem:[%s3067_s16 + $0x50] sm:$0xff]  ;;  %v507_v7 = vld [vmem:[%s3067_s16 + $0x58] sm:$0xff] }
  0x24   : > { %v2583_v4 = vpack.c.bf16 %v557_v61, %v556_v60  ;;  %v1202_v5 = vld [vmem:[%s3676_s6 + $0x8] sm:$0xff]  ;;  %v1204_v8 = vld [vmem:[%s3676_s6 + $0x18] sm:$0xff]  ;;  %v524_v9 = vld [vmem:[%s3067_s16 + $0xe0] sm:$0xff]  ;;  %v2640_v11 = vpack.c.bf16 %v507_v7, %v506_v6 }
  0x25   : > { %v525_v10 = vld [vmem:[%s3067_s16 + $0xe8] sm:$0xff]  ;;  %1212 = vperm.xlu0 %2829, %v1202_v5   ;;  %v540_v12 = vld [vmem:[%s3095_s23 + $0x40] sm:$0xff]  ;;  %1222 = vperm.xlu1 %2830, %v1204_v8   ;;  %v558_v16 = vld [vmem:[%s3095_s23 + $0xd0] sm:$0xff] }
  0x26   : > { %2570 = vmatpush3.bf16.xpose.msk.msra.mxu1 %vm3071_vm1, %v2568_v38  ;;  %v541_v13 = vld [vmem:[%s3095_s23 + $0x48] sm:$0xff]  ;;  %v1245_v14 = vld [vmem:[%s3678_s8] sm:$0xff]  ;;  %v2643_v15 = vpack.c.bf16 %v525_v10, %v524_v9  ;;  %v559_v17 = vld [vmem:[%s3095_s23 + $0xd8] sm:$0xff] }
  0x27   : > { %2573 = vmatprep.subr.msk.bf16.mxu1 %vm3071_vm1, %v2571_v39  ;;  %v1246_v18 = vld [vmem:[%s3678_s8 + $0x8] sm:$0xff]  ;;  %v2586_v19 = vpack.c.bf16 %v541_v13, %v540_v12  ;;  %v2589_v20 = vpack.c.bf16 %v559_v17, %v558_v16  ;;  %v1247_v21 = vld [vmem:[%s3678_s8 + $0x10] sm:$0xff]  ;;  %v508_v22 = vld [vmem:[%s3067_s16 + $0x60] sm:$0xff] }
  0x28   : > { %v509_v23 = vld [vmem:[%s3067_s16 + $0x68] sm:$0xff]  ;;  %v1248_v24 = vld [vmem:[%s3678_s8 + $0x18] sm:$0xff]  ;;  %v526_v25 = vld [vmem:[%s3067_s16 + $0xf0] sm:$0xff] }
  0x29   : > { %1251 = vperm.xlu0 %2829, %v1245_v14   ;;  %1256 = vperm.xlu1 %2830, %v1246_v18   ;;  %v527_v26 = vld [vmem:[%s3067_s16 + $0xf8] sm:$0xff]  ;;  %v2646_v27 = vpack.c.bf16 %v509_v23, %v508_v22  ;;  %v542_v28 = vld [vmem:[%s3095_s23 + $0x50] sm:$0xff]  ;;  %v561_v32 = vld [vmem:[%s3095_s23 + $0xe8] sm:$0xff] }
  0x2a   : > { %2624 = vmatpush3.bf16.xpose.msk.msra.mxu0 %vm3071_vm1, %v2622_v31  ;;  %v543_v29 = vld [vmem:[%s3095_s23 + $0x58] sm:$0xff]  ;;  %v2649_v30 = vpack.c.bf16 %v527_v26, %v526_v25  ;;  %v560_v31 = vld [vmem:[%s3095_s23 + $0xe0] sm:$0xff]  ;;  %v980_v38 = vld [vmem:[%s3213_s27 + $0x88] sm:$0xff] }
  0x2b   : > { %2627 = vmatprep.subr.msk.bf16.mxu0 %vm3071_vm1, %v2625_v35  ;;  %v2592_v33 = vpack.c.bf16 %v543_v29, %v542_v28  ;;  %v2595_v34 = vpack.c.bf16 %v561_v32, %v560_v31  ;;  %v510_v35 = vld [vmem:[%s3067_s16 + $0x70] sm:$0xff]  ;;  %v511_v36 = vld [vmem:[%s3067_s16 + $0x78] sm:$0xff]  ;;  %v979_v37 = vld [vmem:[%s3213_s27 + $0x80] sm:$0xff]  ;;  %s442_s16 = sand.u32 1, %s2909_s17   ;;  %s1816_s17 = ssub.s32 (%p3038_p4), 38, %s3043_s26 }
  0x2c   : > { %v2652_v39 = vpack.c.bf16 %v511_v36, %v510_v35  ;;  %v544_v40 = vld [vmem:[%s3095_s23 + $0x60] sm:$0xff]  ;;  %v545_v41 = vld [vmem:[%s3095_s23 + $0x68] sm:$0xff]  ;;  %v2655_v42 = vpack.c.bf16 %v980_v38, %v979_v37  ;;  %v562_v43 = vld [vmem:[%s3095_s23 + $0xf0] sm:$0xff]  ;;  %p1817_p8 = scmp.lt.s32.totalorder (%p3038_p4), %s1816_s17, 32 }
  0x2d   : > { %1261 = vperm.xlu0 %2829, %v1247_v21   ;;  %1266 = vperm.xlu1 %2830, %v1248_v24   ;;  %v2598_v46 = vpack.c.bf16 %v545_v41, %v544_v40  ;;  %v963_v48 = vld [vmem:[%s3213_s27] sm:$0xff]  ;;  %v964_v49 = vld [vmem:[%s3213_s27 + $0x8] sm:$0xff]  ;;  %v546_v53 = vld [vmem:[%s3095_s23 + $0x70] sm:$0xff] }
  0x2e   : > { %2576 = vmatpush3.bf16.xpose.msk.msra.mxu1 %vm3071_vm1, %v2574_v50  ;;  %v981_v50 = vld [vmem:[%s3213_s27 + $0x90] sm:$0xff]  ;;  %v2658_v52 = vpack.c.bf16 %v964_v49, %v963_v48  ;;  %v547_v54 = vld [vmem:[%s3095_s23 + $0x78] sm:$0xff]  ;;  %v983_v61 = vld [vmem:[%s3213_s27 + $0xa0] sm:$0xff] }
  0x2f   : > { %2579 = vmatprep.subr.msk.bf16.mxu1 %vm3071_vm1, %v2577_v51  ;;  %v982_v51 = vld [vmem:[%s3213_s27 + $0x98] sm:$0xff]  ;;  %v2604_v57 = vpack.c.bf16 %v547_v54, %v546_v53  ;;  %v965_v58 = vld [vmem:[%s3213_s27 + $0x10] sm:$0xff]  ;;  %v968_v5 = vld [vmem:[%s3213_s27 + $0x28] sm:$0xff] }
  0x30   : > { %v2661_v55 = vpack.c.bf16 %v982_v51, %v981_v50  ;;  %v494_v60 = vld [vmem:[%s3673_s3 + $0x10] sm:$0xff]  ;;  %v959_v6 = vld [vmem:[%s3675_s5] sm:$0xff]  ;;  %v986_v8 = vld [vmem:[%s3213_s27 + $0xb8] sm:$0xff] }
  0x31   : > { %v985_v7 = vld [vmem:[%s3213_s27 + $0xb0] sm:$0xff]  ;;  %v970_v13 = vld [vmem:[%s3213_s27 + $0x38] sm:$0xff]  ;;  %v987_v14 = vld [vmem:[%s3213_s27 + $0xc0] sm:$0xff] }
  0x32   : > { %2630 = vmatpush3.bf16.xpose.msk.msra.mxu0 %vm3071_vm1, %v2628_v44  ;;  %v563_v44 = vld [vmem:[%s3095_s23 + $0xf8] sm:$0xff]  ;;  %v530_v10 = vld [vmem:[%s3674_s4 + $0x10] sm:$0xff]  ;;  %v971_v18 = vld [vmem:[%s3213_s27 + $0x40] sm:$0xff]  ;;  %s2175_s23 = sshll.u32 %s442_s16, 8 }
  0x33   : > { %2633 = vmatprep.subr.msk.bf16.mxu0 %vm3071_vm1, %v2631_v47  ;;  %v2601_v47 = vpack.c.bf16 %v563_v44, %v562_v43  ;;  %v969_v12 = vld [vmem:[%s3213_s27 + $0x30] sm:$0xff]  ;;  %v990_v21 = vld [vmem:[%s3213_s27 + $0xd8] sm:$0xff]  ;;  %v991_v26 = vld [vmem:[%s3213_s27 + $0xe0] sm:$0xff]  ;;  %s3435_s30 = scalar_lea.vmem [#allocation2], %s2175_s23  }
  0x34   : > { %v2676_v16 = vpack.c.bf16 %v970_v13, %v969_v12  ;;  %v973_v24 = vld [vmem:[%s3213_s27 + $0x50] sm:$0xff]  ;;  %v974_v25 = vld [vmem:[%s3213_s27 + $0x58] sm:$0xff]  ;;  %v976_v31 = vld [vmem:[%s3213_s27 + $0x68] sm:$0xff] }
  0x35   : > { %v2688_v28 = vpack.c.bf16 %v974_v25, %v973_v24  ;;  %v993_v32 = vld [vmem:[%s3213_s27 + $0xf0] sm:$0xff]  ;;  %v978_v37 = vld [vmem:[%s3213_s27 + $0x78] sm:$0xff] }
  0x36   : > { %2582 = vmatpush3.bf16.xpose.msk.msra.mxu1 %vm3071_vm1, %v2580_v3  ;;  %v495_v3 = vld [vmem:[%s3673_s3 + $0x18] sm:$0xff]  ;;  %v977_v36 = vld [vmem:[%s3213_s27 + $0x70] sm:$0xff] }
  0x37   : > { %2585 = vmatprep.subr.msk.bf16.mxu1 %vm3071_vm1, %v2583_v4  ;;  %v967_v4 = vld [vmem:[%s3213_s27 + $0x20] sm:$0xff]  ;;  %v2700_v38 = vpack.c.bf16 %v978_v37, %v977_v36  ;;  %v961_v40 = vld [vmem:[%s3675_s5 + $0x10] sm:$0xff]  ;;  %v962_v41 = vld [vmem:[%s3675_s5 + $0x18] sm:$0xff] }
  0x38   : > { %v2670_v9 = vpack.c.bf16 %v968_v5, %v967_v4 }
  0x3a   : > { %2636 = vmatpush3.bf16.xpose.msk.msra.mxu0 %vm3071_vm1, %v2634_v56  ;;  %v493_v56 = vld [vmem:[%s3673_s3 + $0x8] sm:$0xff] }
  0x3b   : > { %2639 = vmatprep.subr.msk.bf16.mxu0 %vm3071_vm1, %v2637_v59  ;;  %v966_v59 = vld [vmem:[%s3213_s27 + $0x18] sm:$0xff] }
  0x3c   : > { %v2664_v62 = vpack.c.bf16 %v966_v59, %v965_v58 }
  0x3e   : > { %2588 = vmatpush3.bf16.xpose.msk.msra.mxu1 %vm3071_vm1, %v2586_v19  ;;  %v972_v19 = vld [vmem:[%s3213_s27 + $0x48] sm:$0xff] }
  0x3f   : > { %2591 = vmatprep.subr.msk.bf16.mxu1 %vm3071_vm1, %v2589_v20  ;;  %v989_v20 = vld [vmem:[%s3213_s27 + $0xd0] sm:$0xff]  ;;  %v2682_v22 = vpack.c.bf16 %v972_v19, %v971_v18 }
  0x40   : > { %v2685_v23 = vpack.c.bf16 %v990_v21, %v989_v20 }
  0x42   : > { %2642 = vmatpush3.bf16.xpose.msk.msra.mxu0 %vm3071_vm1, %v2640_v11  ;;  %v2673_v11 = vpack.c.bf16 %v986_v8, %v985_v7 }
  0x43   : > { %2645 = vmatprep.subr.msk.bf16.mxu0 %vm3071_vm1, %v2643_v15  ;;  %v988_v15 = vld [vmem:[%s3213_s27 + $0xc8] sm:$0xff] }
  0x44   : > { %v2679_v17 = vpack.c.bf16 %v988_v15, %v987_v14 }
  0x46   : > { %2594 = vmatpush3.bf16.xpose.msk.msra.mxu1 %vm3071_vm1, %v2592_v33  ;;  %v994_v33 = vld [vmem:[%s3213_s27 + $0xf8] sm:$0xff] }
  0x47   : > { %2597 = vmatprep.subr.msk.bf16.mxu1 %vm3071_vm1, %v2595_v34  ;;  %v2697_v35 = vpack.c.bf16 %v994_v33, %v993_v32 }
  0x4a   : > { %2648 = vmatpush3.bf16.xpose.msk.msra.mxu0 %vm3071_vm1, %v2646_v27  ;;  %v992_v27 = vld [vmem:[%s3213_s27 + $0xe8] sm:$0xff] }
  0x4b   : > { %2651 = vmatprep.subr.msk.bf16.mxu0 %vm3071_vm1, %v2649_v30  ;;  %v2691_v29 = vpack.c.bf16 %v992_v27, %v991_v26  ;;  %v975_v30 = vld [vmem:[%s3213_s27 + $0x60] sm:$0xff] }
  0x4c   : > { %v2694_v34 = vpack.c.bf16 %v976_v31, %v975_v30  ;;  %v1241_v27 = vld [vmem:[%s3677_s7] sm:$0xff]  ;;  %v1244_v30 = vld [vmem:[%s3677_s7 + $0x18] sm:$0xff] }
  0x4e   : > { %2600 = vmatpush3.bf16.xpose.msk.msra.mxu1 %vm3071_vm1, %v2598_v46 }
  0x4f   : > { %2603 = vmatprep.subr.msk.bf16.mxu1 %vm3071_vm1, %v2601_v47 }
  0x52   : > { %2654 = vmatpush3.bf16.xpose.msk.msra.mxu0 %vm3071_vm1, %v2652_v39  ;;  %v960_v39 = vld [vmem:[%s3675_s5 + $0x8] sm:$0xff] }
  0x53   : > { %2657 = vmatprep.subr.msk.bf16.mxu0 %vm3233_vm3, %v2655_v42  ;;  %v2952_v42 = vmov 0.0  }
  0x56   : > { %2606 = vmatpush3.bf16.xpose.msk.msra.mxu1 %vm3071_vm1, %v2604_v57 }
  0x59   : > { %2420 = vmatmul.mubr.msk.f32.vlgmr.msra.gmra.mrb[0].mxu0 %vm564_vm0, %v3048_v0  ;;  %v984_v0 = vld [vmem:[%s3213_s27 + $0xa8] sm:$0xff] }
  0x5a   : > { %2660 = vmatpush3.bf16.xpose.msk.msra.mxu0 %vm3233_vm3, %v2658_v52  ;;  %2421 = vmatprep.mubr.msk.f32.mxu0 %vm564_vm0, %v493_v56  ;;  %v2667_v63 = vpack.c.bf16 %v984_v0, %v983_v61 }
  0x5b   : > { %2663 = vmatprep.subr.msk.bf16.mxu0 %vm3233_vm3, %v2661_v55 }
  0x5d   : > { %2422 = vmatmul.mubr.msk.f32.gmra.mrb[2].mxu0 %vm564_vm0, %v493_v56  ;;  %2380 = vmatmul.mubr.msk.f32.vlgmr.msra.gmra.mrb[0].mxu1 %vm564_vm0, %v3057_v1  ;;  %v531_v1 = vld [vmem:[%s3674_s4 + $0x18] sm:$0xff] }
  0x5e   : > { %2423 = vmatprep.mubr.msk.f32.mxu0 %vm564_vm0, %v494_v60  ;;  %2381 = vmatprep.mubr.msk.f32.mxu1 %vm564_vm0, %v529_v2 }
  0x61   : > { %2424 = vmatmul.mubr.msk.f32.gmra.mrb[4].mxu0 %vm564_vm0, %v494_v60  ;;  %2382 = vmatmul.mubr.msk.f32.gmra.mrb[2].mxu1 %vm564_vm0, %v529_v2 }
  0x62   : > { %2666 = vmatpush3.bf16.xpose.msk.msra.mxu0 %vm3233_vm3, %v2664_v62  ;;  %2425 = vmatprep.mubr.msk.f32.mxu0 %vm564_vm0, %v495_v3 }
  0x63   : > { %2669 = vmatprep.subr.msk.bf16.mxu0 %vm3233_vm3, %v2667_v63  ;;  %2383 = vmatprep.mubr.msk.f32.mxu1 %vm564_vm0, %v530_v10 }
  0x65   : > { %2426 = vmatmul.mubr.msk.f32.gmra.mrb[6].mxu0 %vm564_vm0, %v495_v3  ;;  %2384 = vmatmul.mubr.msk.f32.gmra.mrb[4].mxu1 %vm564_vm0, %v530_v10 }
  0x66   : > { %2459 = vmatprep.mubr.msk.f32.mxu0 %vm995_vm2, %v959_v6  ;;  %2385 = vmatprep.mubr.msk.f32.mxu1 %vm564_vm0, %v531_v1 }
  0x69   : > { %2386 = vmatmul.mubr.msk.f32.gmra.mrb[6].mxu1 %vm564_vm0, %v531_v1 }
  0x6a   : > { %2672 = vmatpush3.bf16.xpose.msk.msra.mxu0 %vm3233_vm3, %v2670_v9  ;;  %1358 = vmatprep.mubr.f32.mxu1 %v2952_v42 }
  0x6b   : > { %2675 = vmatprep.subr.msk.bf16.mxu0 %vm3233_vm3, %v2673_v11 }
  0x72   : > { %2678 = vmatpush3.bf16.xpose.msk.msra.mxu0 %vm3233_vm3, %v2676_v16 }
  0x73   : > { %2681 = vmatprep.subr.msk.bf16.mxu0 %vm3233_vm3, %v2679_v17 }
  0x7a   : > { %2684 = vmatpush3.bf16.xpose.msk.msra.mxu0 %vm3233_vm3, %v2682_v22 }
  0x7b   : > { %2687 = vmatprep.subr.msk.bf16.mxu0 %vm3233_vm3, %v2685_v23 }
  0x82   : > { %2690 = vmatpush3.bf16.xpose.msk.msra.mxu0 %vm3233_vm3, %v2688_v28  ;;  %v1243_v28 = vld [vmem:[%s3677_s7 + $0x10] sm:$0xff] }
  0x83   : > { %2693 = vmatprep.subr.msk.bf16.mxu0 %vm3233_vm3, %v2691_v29  ;;  %v1242_v29 = vld [vmem:[%s3677_s7 + $0x8] sm:$0xff] }
  0x8a   : > { %2696 = vmatpush3.bf16.xpose.msk.msra.mxu0 %vm3233_vm3, %v2694_v34 }
  0x8b   : > { %2699 = vmatprep.subr.msk.bf16.mxu0 %vm3233_vm3, %v2697_v35 }
  0x8c   : > { %v1208_v51 = vpop.permute.xlu0 %1207  ;;  %v1218_v63 = vpop.permute.xlu1 %1217 }
  0x92   : > { %2702 = vmatpush3.bf16.xpose.msk.msra.mxu0 %vm3233_vm3, %v2700_v38 }
  0x99   : > { %2460 = vmatmul.mubr.msk.f32.vlgmr.msra.gmra.mrb[0].mxu0 %vm995_vm2, %v959_v6 }
  0x9a   : > { %2461 = vmatprep.mubr.msk.f32.mxu0 %vm995_vm2, %v960_v39 }
  0x9d   : > { %2462 = vmatmul.mubr.msk.f32.gmra.mrb[2].mxu0 %vm995_vm2, %v960_v39 }
  0x9e   : > { %2463 = vmatprep.mubr.msk.f32.mxu0 %vm995_vm2, %v961_v40 }
  0xa1   : > { %2464 = vmatmul.mubr.msk.f32.gmra.mrb[4].mxu0 %vm995_vm2, %v961_v40 }
  0xa2   : > { %2465 = vmatprep.mubr.msk.f32.mxu0 %vm995_vm2, %v962_v41 }
  0xa4   : > { %v1213_v61 = vpop.permute.xlu0 %1212  ;;  %v1223_v1 = vpop.permute.xlu1 %1222 }
  0xa5   : > { %2466 = vmatmul.mubr.msk.f32.gmra.mrb[6].mxu0 %vm995_vm2, %v962_v41 }
  0xa6   : > { %1346 = vmatprep.mubr.f32.mxu0 %v2952_v42 }
  0xa8   : > { %v1252_v31 = vpop.permute.xlu0 %1251  ;;  %v1257_v38 = vpop.permute.xlu1 %1256 }
 0x130   : > { %v739_v43 = vpop.f32.mrb[0].mxu1 }
 0x131   : > { %v741_v44 = vpop.f32.mrb[1].mxu1 }
 0x134   : > { %v745_v45 = vpop.f32.mrb[2].mxu1 }
 0x135   : > { %v747_v46 = vpop.f32.mrb[3].mxu1 }
 0x138   : > { %v751_v47 = vpop.f32.mrb[4].mxu1 }
 0x139   : > { %v753_v48 = vpop.f32.mrb[5].mxu1 }
 0x13c   : > { %v757_v49 = vpop.f32.mrb[6].mxu1 }
 0x13d   : > { %v759_v50 = vpop.f32.mrb[7].mxu1 }
 0x16c   : > { %v1170_v52 = vpop.f32.mrb[0].mxu0 }
 0x16d   : > { %v2723_v53 = vadd.f32 %v1170_v52, %v739_v43  ;;  %v1172_v54 = vpop.f32.mrb[1].mxu0 }
 0x16e   : > { %v2724_v55 = vadd.f32 %v1172_v54, %v741_v44  ;;  %v1262_v44 = vpop.permute.xlu0 %1261 }
 0x16f   : > { %v1225_v56 = vadd.f32 %v2723_v53, %v1208_v51 }
 0x170   : > { %v1226_v57 = vadd.f32 %v2724_v55, %v1208_v51  ;;  %v1176_v58 = vpop.f32.mrb[2].mxu0  ;;  %v1381_v55 = vld [vmem:[%s3679_s9 + $0x10] sm:$0xff] }
 0x171   : > { %v2725_v59 = vadd.f32 %v1176_v58, %v745_v45  ;;  %v1178_v60 = vpop.f32.mrb[3].mxu0  ;;  %2831 = vtanh.f32 %v1225_v56  ;;  %v1382_v56 = vld [vmem:[%s3679_s9 + $0x18] sm:$0xff] }
 0x172   : > { %v2726_v0 = vadd.f32 %v1178_v60, %v747_v46  ;;  %2833 = vtanh.f32 %v1226_v57  ;;  %v2715_v58 = vpack.c.bf16 %v1382_v56, %v1381_v55 }
 0x173   : > { %v1227_v62 = vadd.f32 %v2725_v59, %v1213_v61 }
 0x174   : > { %v1228_v3 = vadd.f32 %v2726_v0, %v1213_v61  ;;  %v1182_v2 = vpop.f32.mrb[4].mxu0 }
 0x175   : > { %2835 = vtanh.f32 %v1227_v62  ;;  %v2727_v4 = vadd.f32 %v1182_v2, %v751_v47  ;;  %v1184_v5 = vpop.f32.mrb[5].mxu0 }
 0x176   : > { %2837 = vtanh.f32 %v1228_v3  ;;  %v2728_v6 = vadd.f32 %v1184_v5, %v753_v48  ;;  %v1267_v48 = vpop.permute.xlu1 %1266 }
 0x177   : > { %v1229_v7 = vadd.f32 %v2727_v4, %v1218_v63 }
 0x178   : > { %v1230_v8 = vadd.f32 %v2728_v6, %v1218_v63  ;;  %v1188_v9 = vpop.f32.mrb[6].mxu0 }
 0x179   : > { %v2729_v10 = vadd.f32 %v1188_v9, %v757_v49  ;;  %v1190_v11 = vpop.f32.mrb[7].mxu0  ;;  %2839 = vtanh.f32 %v1229_v7  ;;  %v1379_v49 = vld [vmem:[%s3679_s9] sm:$0xff] }
 0x17a   : > { %v2730_v12 = vadd.f32 %v1190_v11, %v759_v50  ;;  %2841 = vtanh.f32 %v1230_v8  ;;  %v1380_v50 = vld [vmem:[%s3679_s9 + $0x8] sm:$0xff] }
 0x17b   : > { %v1231_v13 = vadd.f32 %v2729_v10, %v1223_v1  ;;  %v2832_v15 = vpop.eup %2831  ;;  %v2711_v52 = vpack.c.bf16 %v1380_v50, %v1379_v49 }
 0x17c   : > { %v1232_v14 = vadd.f32 %v2730_v12, %v1223_v1  ;;  %v2834_v16 = vpop.eup %2833 }
 0x17d   : > { %2843 = vtanh.f32 %v1231_v13 }
 0x17e   : > { %2845 = vtanh.f32 %v1232_v14 }
 0x17f   : > { %v2836_v17 = vpop.eup %2835 }
 0x180   : > { %v2838_v18 = vpop.eup %2837  ;;  %v2705_v19 = vpack.c.bf16 %v2836_v17, %v2832_v15 }
 0x181   : > { %v2703_v20 = vpack.c.bf16 %v2838_v18, %v2834_v16 }
 0x183   : > { %2704 = vmatprep.subr.bf16.mxu0 %v2703_v20  ;;  %2719 = vmatprep.subr.bf16.mxu1 %v2703_v20  ;;  %v2840_v21 = vpop.eup %2839 }
 0x184   : > { %2706 = vmatpush1.bf16.msra.mxu0 %v2705_v19  ;;  %2721 = vmatpush1.bf16.msra.mxu1 %v2705_v19  ;;  %v2842_v22 = vpop.eup %2841 }
 0x187   : > { %v2844_v23 = vpop.eup %2843 }
 0x188   : > { %v2846_v24 = vpop.eup %2845  ;;  %v2709_v25 = vpack.c.bf16 %v2844_v23, %v2840_v21 }
 0x189   : > { %v2707_v26 = vpack.c.bf16 %v2846_v24, %v2842_v22 }
 0x18b   : > { %2708 = vmatprep.subr.bf16.mxu0 %v2707_v26  ;;  %2720 = vmatprep.subr.bf16.mxu1 %v2707_v26 }
 0x18c   : > { %2710 = vmatpush1.bf16.msra.mxu0 %v2709_v25  ;;  %2722 = vmatpush1.bf16.msra.mxu1 %v2709_v25 }
 0x18d   : > { %2712 = vmatprep.subr.bf16.mxu1 %v2711_v52 }
 0x18f   : > { %2290 = vmatmul.mubr.msk.f32.vlgmr.msra.gmra.mrb[8].mxu0 %vm1269_vm4, %v1241_v27  ;;  %2292 = vmatmul.mubr.msk.f32.vlgmr.msra.gmra.mrb[8].mxu1 %vm1269_vm4, %v1243_v28 }
 0x190   : > { %1352 = vmatprep.mubr.f32.mxu0 %v2952_v42  ;;  %1364 = vmatprep.mubr.f32.mxu1 %v2952_v42 }
 0x191   : > { %2714 = vmatpush3.bf16.msra.mxu1 %v2711_v52 }
 0x192   : > { %2716 = vmatprep.subr.bf16.mxu1 %v2715_v58 }
 0x193   : > { %2291 = vmatmul.mubr.msk.f32.gmra.mrb[10].mxu0 %vm1269_vm4, %v1242_v29  ;;  %2293 = vmatmul.mubr.msk.f32.gmra.mrb[10].mxu1 %vm1269_vm4, %v1244_v30 }
 0x195   : > { %2718 = vmatpush3.bf16.msra.mxu1 %v2715_v58 }
 0x262   : > { %v1348_v32 = vpop.f32.mrb[8].mxu0  ;;  %v1360_v33 = vpop.f32.mrb[8].mxu1 }
 0x263   : > { %v1349_v34 = vadd.f32 %v1348_v32, %v1252_v31  ;;  %v1350_v35 = vpop.f32.mrb[9].mxu0  ;;  %v1362_v36 = vpop.f32.mrb[9].mxu1  ;;  %v1361_v46 = vadd.f32 %v1360_v33, %v1262_v44  ;;  %v3431_v33 = vld [vmem:[%s3680_s10] ss:$0 sm:$0xff] }
 0x264   : > { %v1351_v37 = vadd.f32 %v1350_v35, %v1252_v31  ;;  %v1363_v47 = vadd.f32 %v1362_v36, %v1262_v44 }
 0x265   : > { %2847 = vtanh.f32 %v1349_v34 }
 0x266   : > { %v1354_v39 = vpop.f32.mrb[10].mxu0  ;;  %v1366_v40 = vpop.f32.mrb[10].mxu1  ;;  %2849 = vtanh.f32 %v1351_v37 }
 0x267   : > { %v1355_v41 = vadd.f32 %v1354_v39, %v1257_v38  ;;  %v1356_v42 = vpop.f32.mrb[11].mxu0  ;;  %v1368_v43 = vpop.f32.mrb[11].mxu1  ;;  %v1367_v51 = vadd.f32 %v1366_v40, %v1267_v48 }
 0x268   : > { %v1357_v45 = vadd.f32 %v1356_v42, %v1257_v38  ;;  %v1369_v54 = vadd.f32 %v1368_v43, %v1267_v48 }
 0x269   : > { %2851 = vtanh.f32 %v1355_v41 }
 0x26a   : > { %2853 = vtanh.f32 %v1357_v45 }
 0x26b   : > { %2855 = vtanh.f32 %v1361_v46 }
 0x26c   : > { %2857 = vtanh.f32 %v1363_v47 }
 0x26d   : > { %2859 = vtanh.f32 %v1367_v51 }
 0x26e   : > { %2861 = vtanh.f32 %v1369_v54 }
 0x26f   : > { %v2848_v53 = vpop.eup %2847 }
 0x270   : > { %1390 = vxpose.xlu0.b32.start [1/4] (short) %v2848_v53, 128  ;;  %v2850_v57 = vpop.eup %2849 }
 0x271   : > { %1422 = vxpose.xlu1.b32.start [1/4] (short) %v2850_v57, 128 }
 0x273   : > { %v2852_v59 = vpop.eup %2851 }
 0x274   : > { %1391 = vxpose.xlu0.b32.cont [2/4] (short) %v2852_v59, 128  ;;  %v2854_v60 = vpop.eup %2853 }
 0x275   : > { %1423 = vxpose.xlu1.b32.cont [2/4] (short) %v2854_v60, 128  ;;  %v2856_v61 = vpop.eup %2855 }
 0x276   : > { %v2858_v0 = vpop.eup %2857 }
 0x277   : > { %v2860_v62 = vpop.eup %2859 }
 0x278   : > { %1392 = vxpose.xlu0.b32.cont [3/4] (short) %v2856_v61, 128  ;;  %v2862_v63 = vpop.eup %2861 }
 0x279   : > { %1424 = vxpose.xlu1.b32.cont [3/4] (short) %v2858_v0, 128 }
 0x27c   : > { %1393 = vxpose.xlu0.b32.end [4/4] (short) %v2860_v62, 128 }
 0x27d   : > { %1425 = vxpose.xlu1.b32.end [4/4] (short) %v2862_v63, 128 }
 0x2f0   : > { %v1406_v3 = vpop.trf.xlu0 }
 0x2f1   : > { %2511 = vmatprep.mubr.msk.f32.mxu1 %vm1269_vm4, %v1406_v3  ;;  %v1438_v2 = vpop.trf.xlu1 }
 0x2f4   : > { %v1407_v4 = vpop.trf.xlu0 }
 0x2f5   : > { %2512 = vmatmul.mubr.msk.f32.vlgmr.msra.gmra.mrb[12].mxu1 %vm1269_vm4, %v1407_v4  ;;  %v1439_v5 = vpop.trf.xlu1 }
 0x2f8   : > { %v1408_v6 = vpop.trf.xlu0 }
 0x2f9   : > { %2514 = vmatprep.mubr.msk.f32.mxu1 %vm1269_vm4, %v1408_v6  ;;  %v1440_v8 = vpop.trf.xlu1 }
 0x2fc   : > { %v1409_v7 = vpop.trf.xlu0 }
 0x2fd   : > { %2515 = vmatmul.mubr.msk.f32.gmra.mrb[14].mxu1 %vm1269_vm4, %v1409_v7  ;;  %v1441_v10 = vpop.trf.xlu1 }
 0x300   : > { %v1410_v9 = vpop.trf.xlu0 }
 0x301   : > { %2517 = vmatprep.mubr.msk.f32.mxu1 %vm1269_vm4, %v1410_v9  ;;  %v1442_v12 = vpop.trf.xlu1 }
 0x304   : > { %v1411_v11 = vpop.trf.xlu0 }
 0x305   : > { %2518 = vmatmul.mubr.msk.f32.gmra.mrb[16].mxu1 %vm1269_vm4, %v1411_v11  ;;  %v1443_v14 = vpop.trf.xlu1 }
 0x308   : > { %v1412_v1 = vpop.trf.xlu0 }
 0x309   : > { %2520 = vmatprep.mubr.msk.f32.mxu1 %vm1269_vm4, %v1412_v1  ;;  %v1444_v17 = vpop.trf.xlu1 }
 0x30c   : > { %v1413_v13 = vpop.trf.xlu0 }
 0x30d   : > { %2521 = vmatmul.mubr.msk.f32.gmra.mrb[18].mxu1 %vm1269_vm4, %v1413_v13  ;;  %v1445_v19 = vpop.trf.xlu1 }
 0x310   : > { %v1414_v15 = vpop.trf.xlu0 }
 0x311   : > { %2523 = vmatprep.mubr.msk.f32.mxu1 %vm1269_vm4, %v1414_v15  ;;  %v1446_v22 = vpop.trf.xlu1 }
 0x314   : > { %v1415_v16 = vpop.trf.xlu0 }
 0x315   : > { %2524 = vmatmul.mubr.msk.f32.gmra.mrb[20].mxu1 %vm1269_vm4, %v1415_v16  ;;  %v1447_v24 = vpop.trf.xlu1 }
 0x318   : > { %v1416_v18 = vpop.trf.xlu0 }
 0x319   : > { %2526 = vmatprep.mubr.msk.f32.mxu1 %vm1269_vm4, %v1416_v18  ;;  %v1448_v27 = vpop.trf.xlu1 }
 0x31c   : > { %v1417_v20 = vpop.trf.xlu0 }
 0x31d   : > { %2527 = vmatmul.mubr.msk.f32.gmra.mrb[22].mxu1 %vm1269_vm4, %v1417_v20  ;;  %v1449_v28 = vpop.trf.xlu1 }
 0x320   : > { %v1418_v21 = vpop.trf.xlu0 }
 0x321   : > { %2529 = vmatprep.mubr.msk.f32.mxu1 %vm1269_vm4, %v1418_v21  ;;  %v1450_v29 = vpop.trf.xlu1 }
 0x324   : > { %v1419_v23 = vpop.trf.xlu0 }
 0x325   : > { %2530 = vmatmul.mubr.msk.f32.gmra.mrb[24].mxu1 %vm1269_vm4, %v1419_v23  ;;  %v1451_v30 = vpop.trf.xlu1 }
 0x328   : > { %v1420_v25 = vpop.trf.xlu0 }
 0x329   : > { %2532 = vmatprep.mubr.msk.f32.mxu1 %vm1269_vm4, %v1420_v25  ;;  %v1452_v31 = vpop.trf.xlu1 }
 0x32c   : > { %v1421_v26 = vpop.trf.xlu0 }
 0x32d   : > { %2533 = vmatmul.mubr.msk.f32.gmra.mrb[26].mxu1 %vm1269_vm4, %v1421_v26  ;;  %v1453_v32 = vpop.trf.xlu1 }
 0x32e   : > { %2535 = vmatprep.mubr.msk.f32.mxu1 %vm1269_vm4, %v1438_v2 }
 0x331   : > { %2536 = vmatmul.mubr.msk.f32.gmra.mrb[28].mxu1 %vm1269_vm4, %v1439_v5 }
 0x332   : > { %2538 = vmatprep.mubr.msk.f32.mxu1 %vm1269_vm4, %v1440_v8 }
 0x335   : > { %2539 = vmatmul.mubr.msk.f32.gmra.mrb[30].mxu1 %vm1269_vm4, %v1441_v10 }
 0x336   : > { %2541 = vmatprep.mubr.msk.f32.mxu1 %vm1269_vm4, %v1442_v12 }
 0x339   : > { %2542 = vmatmul.mubr.msk.f32.gmra.mrb[32].mxu1 %vm1269_vm4, %v1443_v14 }
 0x33a   : > { %2544 = vmatprep.mubr.msk.f32.mxu1 %vm1269_vm4, %v1444_v17 }
 0x33d   : > { %2545 = vmatmul.mubr.msk.f32.gmra.mrb[34].mxu1 %vm1269_vm4, %v1445_v19 }
 0x33e   : > { %2547 = vmatprep.mubr.msk.f32.mxu1 %vm1269_vm4, %v1446_v22 }
 0x341   : > { %2548 = vmatmul.mubr.msk.f32.gmra.mrb[36].mxu1 %vm1269_vm4, %v1447_v24 }
 0x342   : > { %2550 = vmatprep.mubr.msk.f32.mxu1 %vm1269_vm4, %v1448_v27 }
 0x345   : > { %2551 = vmatmul.mubr.msk.f32.gmra.mrb[38].mxu1 %vm1269_vm4, %v1449_v28 }
 0x346   : > { %2553 = vmatprep.mubr.msk.f32.mxu1 %vm1269_vm4, %v1450_v29 }
 0x349   : > { %2554 = vmatmul.mubr.msk.f32.gmra.mrb[40].mxu1 %vm1269_vm4, %v1451_v30 }
 0x34a   : > { %2556 = vmatprep.mubr.msk.f32.mxu1 %vm1269_vm4, %v1452_v31 }
 0x34d   : > { %2557 = vmatmul.mubr.msk.f32.gmra.mrb[42].mxu1 %vm1269_vm4, %v1453_v32 }
 0x3c8   : > { %v2513_v34 = vpop.f32.mrb[12].mxu1 }
 0x3c9   : > { %v1622_v35 = vadd.f32 %v2513_v34, %v3431_v33  ;;  %v1616_v36 = vpop.f32.mrb[13].mxu1 }
 0x3ca   : > { %v1617_v37 = vadd.f32 %v3431_v33, %v1616_v36 }
 0x3cb   : > { %1777 = vst.msk [vmem:[%s3435_s30 + $0x8] sm:$0xff] %vm1775_vm5, %v1622_v35 }
 0x3cc   : > { %1776 = vst.msk [vmem:[%s3435_s30] sm:$0xff] %vm1775_vm5, %v1617_v37 }
 0x3d0   : > { %v2516_v38 = vpop.f32.mrb[14].mxu1 }
 0x3d1   : > { %v1632_v39 = vadd.f32 %v2516_v38, %v3431_v33  ;;  %v1626_v40 = vpop.f32.mrb[15].mxu1 }
 0x3d2   : > { %v1627_v41 = vadd.f32 %v3431_v33, %v1626_v40 }
 0x3d3   : > { %1779 = vst.msk [vmem:[%s3435_s30 + $0x18] sm:$0xff] %vm1775_vm5, %v1632_v39 }
 0x3d4   : > { %1778 = vst.msk [vmem:[%s3435_s30 + $0x10] sm:$0xff] %vm1775_vm5, %v1627_v41 }
 0x3d8   : > { %v2519_v42 = vpop.f32.mrb[16].mxu1 }
 0x3d9   : > { %v1642_v43 = vadd.f32 %v2519_v42, %v3431_v33  ;;  %v1636_v44 = vpop.f32.mrb[17].mxu1 }
 0x3da   : > { %v1637_v45 = vadd.f32 %v3431_v33, %v1636_v44 }
 0x3db   : > { %1781 = vst.msk [vmem:[%s3435_s30 + $0x28] sm:$0xff] %vm1775_vm5, %v1642_v43 }
 0x3dc   : > { %1780 = vst.msk [vmem:[%s3435_s30 + $0x20] sm:$0xff] %vm1775_vm5, %v1637_v45 }
 0x3e0   : > { %v2522_v46 = vpop.f32.mrb[18].mxu1 }
 0x3e1   : > { %v1652_v47 = vadd.f32 %v2522_v46, %v3431_v33  ;;  %v1646_v48 = vpop.f32.mrb[19].mxu1 }
 0x3e2   : > { %v1647_v49 = vadd.f32 %v3431_v33, %v1646_v48 }
 0x3e3   : > { %1783 = vst.msk [vmem:[%s3435_s30 + $0x38] sm:$0xff] %vm1775_vm5, %v1652_v47 }
 0x3e4   : > { %1782 = vst.msk [vmem:[%s3435_s30 + $0x30] sm:$0xff] %vm1775_vm5, %v1647_v49 }
 0x3e8   : > { %v2525_v50 = vpop.f32.mrb[20].mxu1 }
 0x3e9   : > { %v1662_v51 = vadd.f32 %v2525_v50, %v3431_v33  ;;  %v1656_v52 = vpop.f32.mrb[21].mxu1 }
 0x3ea   : > { %v1657_v53 = vadd.f32 %v3431_v33, %v1656_v52 }
 0x3eb   : > { %1785 = vst.msk [vmem:[%s3435_s30 + $0x48] sm:$0xff] %vm1775_vm5, %v1662_v51 }
 0x3ec   : > { %1784 = vst.msk [vmem:[%s3435_s30 + $0x40] sm:$0xff] %vm1775_vm5, %v1657_v53 }
 0x3f0   : > { %v2528_v54 = vpop.f32.mrb[22].mxu1 }
 0x3f1   : > { %v1672_v55 = vadd.f32 %v2528_v54, %v3431_v33  ;;  %v1666_v56 = vpop.f32.mrb[23].mxu1 }
 0x3f2   : > { %v1667_v57 = vadd.f32 %v3431_v33, %v1666_v56 }
 0x3f3   : > { %1787 = vst.msk [vmem:[%s3435_s30 + $0x58] sm:$0xff] %vm1775_vm5, %v1672_v55 }
 0x3f4   : > { %1786 = vst.msk [vmem:[%s3435_s30 + $0x50] sm:$0xff] %vm1775_vm5, %v1667_v57 }
 0x3f8   : > { %v2531_v58 = vpop.f32.mrb[24].mxu1 }
 0x3f9   : > { %v1682_v59 = vadd.f32 %v2531_v58, %v3431_v33  ;;  %v1676_v60 = vpop.f32.mrb[25].mxu1 }
 0x3fa   : > { %v1677_v61 = vadd.f32 %v3431_v33, %v1676_v60 }
 0x3fb   : > { %1789 = vst.msk [vmem:[%s3435_s30 + $0x68] sm:$0xff] %vm1775_vm5, %v1682_v59 }
 0x3fc   : > { %1788 = vst.msk [vmem:[%s3435_s30 + $0x60] sm:$0xff] %vm1775_vm5, %v1677_v61 }
 0x400   : > { %v2534_v0 = vpop.f32.mrb[26].mxu1 }
 0x401   : > { %v1692_v62 = vadd.f32 %v2534_v0, %v3431_v33  ;;  %v1686_v63 = vpop.f32.mrb[27].mxu1 }
 0x402   : > { %v1687_v3 = vadd.f32 %v3431_v33, %v1686_v63 }
 0x403   : > { %1791 = vst.msk [vmem:[%s3435_s30 + $0x78] sm:$0xff] %vm1775_vm5, %v1692_v62 }
 0x404   : > { %1790 = vst.msk [vmem:[%s3435_s30 + $0x70] sm:$0xff] %vm1775_vm5, %v1687_v3  ;;  %v2537_v2 = vpop.f32.mrb[28].mxu1 }
 0x405   : > { %v1702_v4 = vadd.f32 %v2537_v2, %v3431_v33  ;;  %v1696_v5 = vpop.f32.mrb[29].mxu1 }
 0x406   : > { %v1697_v6 = vadd.f32 %v3431_v33, %v1696_v5 }
 0x407   : > { %1793 = vst.msk [vmem:[%s3435_s30 + $0x88] sm:$0xff] %vm1775_vm5, %v1702_v4 }
 0x408   : > { %1792 = vst.msk [vmem:[%s3435_s30 + $0x80] sm:$0xff] %vm1775_vm5, %v1697_v6  ;;  %v2540_v7 = vpop.f32.mrb[30].mxu1 }
 0x409   : > { %v1712_v8 = vadd.f32 %v2540_v7, %v3431_v33  ;;  %v1706_v9 = vpop.f32.mrb[31].mxu1 }
 0x40a   : > { %v1707_v10 = vadd.f32 %v3431_v33, %v1706_v9 }
 0x40b   : > { %1795 = vst.msk [vmem:[%s3435_s30 + $0x98] sm:$0xff] %vm1775_vm5, %v1712_v8 }
 0x40c   : > { %1794 = vst.msk [vmem:[%s3435_s30 + $0x90] sm:$0xff] %vm1775_vm5, %v1707_v10  ;;  %v2543_v11 = vpop.f32.mrb[32].mxu1 }
 0x40d   : > { %v1722_v1 = vadd.f32 %v2543_v11, %v3431_v33  ;;  %v1716_v12 = vpop.f32.mrb[33].mxu1 }
 0x40e   : > { %v1717_v13 = vadd.f32 %v3431_v33, %v1716_v12 }
 0x40f   : > { %1797 = vst.msk [vmem:[%s3435_s30 + $0xa8] sm:$0xff] %vm1775_vm5, %v1722_v1 }
 0x410   : > { %1796 = vst.msk [vmem:[%s3435_s30 + $0xa0] sm:$0xff] %vm1775_vm5, %v1717_v13  ;;  %v2546_v14 = vpop.f32.mrb[34].mxu1 }
 0x411   : > { %v1732_v15 = vadd.f32 %v2546_v14, %v3431_v33  ;;  %v1726_v16 = vpop.f32.mrb[35].mxu1 }
 0x412   : > { %v1727_v17 = vadd.f32 %v3431_v33, %v1726_v16 }
 0x413   : > { %1799 = vst.msk [vmem:[%s3435_s30 + $0xb8] sm:$0xff] %vm1775_vm5, %v1732_v15 }
 0x414   : > { %1798 = vst.msk [vmem:[%s3435_s30 + $0xb0] sm:$0xff] %vm1775_vm5, %v1727_v17  ;;  %v2549_v18 = vpop.f32.mrb[36].mxu1 }
 0x415   : > { %v1742_v19 = vadd.f32 %v2549_v18, %v3431_v33  ;;  %v1736_v20 = vpop.f32.mrb[37].mxu1 }
 0x416   : > { %v1737_v21 = vadd.f32 %v3431_v33, %v1736_v20 }
 0x417   : > { %1801 = vst.msk [vmem:[%s3435_s30 + $0xc8] sm:$0xff] %vm1775_vm5, %v1742_v19 }
 0x418   : > { %1800 = vst.msk [vmem:[%s3435_s30 + $0xc0] sm:$0xff] %vm1775_vm5, %v1737_v21  ;;  %v2552_v22 = vpop.f32.mrb[38].mxu1 }
 0x419   : > { %v1752_v23 = vadd.f32 %v2552_v22, %v3431_v33  ;;  %v1746_v24 = vpop.f32.mrb[39].mxu1 }
 0x41a   : > { %v1747_v25 = vadd.f32 %v3431_v33, %v1746_v24 }
 0x41b   : > { %1803 = vst.msk [vmem:[%s3435_s30 + $0xd8] sm:$0xff] %vm1775_vm5, %v1752_v23 }
 0x41c   : > { %1802 = vst.msk [vmem:[%s3435_s30 + $0xd0] sm:$0xff] %vm1775_vm5, %v1747_v25  ;;  %v2555_v26 = vpop.f32.mrb[40].mxu1 }
 0x41d   : > { %v1762_v27 = vadd.f32 %v2555_v26, %v3431_v33  ;;  %v1756_v28 = vpop.f32.mrb[41].mxu1 }
 0x41e   : > { %v1757_v29 = vadd.f32 %v3431_v33, %v1756_v28  ;;  %1814 = sbr.rel (!%p3038_p4) target bundleno = 1117 (0x45d), region = 68 }
 0x41f   : > { %1805 = vst.msk [vmem:[%s3435_s30 + $0xe8] sm:$0xff] %vm1775_vm5, %v1762_v27 }
 0x420   : > { %1804 = vst.msk [vmem:[%s3435_s30 + $0xe0] sm:$0xff] %vm1775_vm5, %v1757_v29  ;;  %v2558_v30 = vpop.f32.mrb[42].mxu1 }
 0x421   : > { %v1772_v31 = vadd.f32 %v2558_v30, %v3431_v33  ;;  %v1766_v32 = vpop.f32.mrb[43].mxu1 }
 0x422   : > { %v1767_v34 = vadd.f32 %v3431_v33, %v1766_v32 }
 0x423   : > { %1807 = vst.msk [vmem:[%s3435_s30 + $0xf8] sm:$0xff] %vm1775_vm5, %v1772_v31 }
 0x424   : > { %1806 = vst.msk [vmem:[%s3435_s30 + $0xf0] sm:$0xff] %vm1775_vm5, %v1767_v34 }
 0x425   : > { %s3696_s17 = smov (!%p1817_p8, %s1816_s17), 32 }
 0x426   : > { %s2329_s19 = sshll.u32 %s3696_s17, 7 }
 0x427   : > { %p2332_p9 = scmp.eq.s32.totalorder %s2329_s19, 0 }
 0x428   : > { %s3544_s22 = sshrl.u32 (!%p2332_p9), %s3696_s17, 5 }
 0x429   : > { %1825 = sbr.rel (%p2332_p9) target bundleno = 1117 (0x45d), region = 72  ;;  %p2333_p10 = scmp.le.s32.totalorder (!%p2332_p9), %s3544_s22, 0 }
 0x430   : > { %2115 = sbr.rel (%p2333_p10) target bundleno = 1096 (0x448), region = 154  ;;  %s3687_s20 = smov (!%p2333_p10), %s3538_s15 }
 0x431   : > { %s3688_s25 = smov (!%p2333_p10), %s3435_s30  ;;  %s3553_s26 = smov (!%p2333_p10), 0  }
 0x432   : > { %s3555_s13 = smov (!%p2333_p10), 0  }
 0x437 LB: >> { %v1949_v33 = vld [vmem:[%s2925_s25] sm:$0xff]  ;;  %v1951_v35 = vld [vmem:[%s2925_s25 + $0x8] sm:$0xff]  ;;  %v1953_v36 = vld [vmem:[%s2925_s25 + $0x10] sm:$0xff]  ;;  %s2013_s16 = sadd.s32 1, %s2929_s26  ;;  %s1943_s13 = sadd.s32 1, %s2933_s13   ;;  %s2933_s13 = sphi %s3555_s13, %s1943_s13   ;;  %s2929_s26 = sphi %s3553_s26, %s3691_s26   ;;  %s2925_s25 = sphi %s3688_s25, %s3690_s25   ;;  %s2921_s20 = sphi %s3687_s20, %s3689_s20  }
 0x438   : >> { %1950 = vst [vmem:[%s2921_s20] sm:$0xff] %v1949_v33  ;;  %1952 = vst [vmem:[%s2921_s20 + $0x8] sm:$0xff] %v1951_v35  ;;  %v1955_v37 = vld [vmem:[%s2925_s25 + $0x18] sm:$0xff]  ;;  %v1957_v38 = vld [vmem:[%s2925_s25 + $0x20] sm:$0xff]  ;;  %p2014_p11 = scmp.ge.s32.totalorder %s2013_s16, %s3544_s22  ;;  %p1942_p12 = scmp.ge.s32.totalorder %s1943_s13, %s3544_s22 }
 0x439   : >> { %1954 = vst [vmem:[%s2921_s20 + $0x10] sm:$0xff] %v1953_v36  ;;  %v1959_v39 = vld [vmem:[%s2925_s25 + $0x28] sm:$0xff]  ;;  %1956 = vst [vmem:[%s2921_s20 + $0x18] sm:$0xff] %v1955_v37  ;;  %v1961_v40 = vld [vmem:[%s2925_s25 + $0x30] sm:$0xff] }
 0x43a   : >> { %1958 = vst [vmem:[%s2921_s20 + $0x20] sm:$0xff] %v1957_v38  ;;  %1960 = vst [vmem:[%s2921_s20 + $0x28] sm:$0xff] %v1959_v39  ;;  %v1963_v41 = vld [vmem:[%s2925_s25 + $0x38] sm:$0xff]  ;;  %v1965_v42 = vld [vmem:[%s2925_s25 + $0x40] sm:$0xff]  ;;  %s3698_s16 = smov (%p2014_p11, %s2013_s16), 0 }
 0x43b   : >> { %1962 = vst [vmem:[%s2921_s20 + $0x30] sm:$0xff] %v1961_v40  ;;  %1964 = vst [vmem:[%s2921_s20 + $0x38] sm:$0xff] %v1963_v41  ;;  %v1967_v43 = vld [vmem:[%s2925_s25 + $0x48] sm:$0xff]  ;;  %v1969_v44 = vld [vmem:[%s2925_s25 + $0x50] sm:$0xff]  ;;  %s2334_s23 = sshll.u32 %s3698_s16, 8  ;;  %s3691_s26 = smov %s3698_s16 }
 0x43c   : >> { %1966 = vst [vmem:[%s2921_s20 + $0x40] sm:$0xff] %v1965_v42  ;;  %v1971_v45 = vld [vmem:[%s2925_s25 + $0x58] sm:$0xff]  ;;  %1968 = vst [vmem:[%s2921_s20 + $0x48] sm:$0xff] %v1967_v43  ;;  %v1973_v46 = vld [vmem:[%s2925_s25 + $0x60] sm:$0xff]  ;;  %s3611_s28 = scalar_lea.vmem %s3435_s30, %s2334_s23 [#allocation2]   ;;  %s2019_s29 = scalar_lea.vmem %s3538_s15, %s2334_s23  }
 0x43d   : >> { %1970 = vst [vmem:[%s2921_s20 + $0x50] sm:$0xff] %v1969_v44  ;;  %1972 = vst [vmem:[%s2921_s20 + $0x58] sm:$0xff] %v1971_v45  ;;  %v1975_v47 = vld [vmem:[%s2925_s25 + $0x68] sm:$0xff]  ;;  %v1977_v48 = vld [vmem:[%s2925_s25 + $0x70] sm:$0xff] }
 0x43e   : >> { %1974 = vst [vmem:[%s2921_s20 + $0x60] sm:$0xff] %v1973_v46  ;;  %1976 = vst [vmem:[%s2921_s20 + $0x68] sm:$0xff] %v1975_v47  ;;  %v1979_v49 = vld [vmem:[%s2925_s25 + $0x78] sm:$0xff]  ;;  %v1981_v50 = vld [vmem:[%s2925_s25 + $0x80] sm:$0xff] }
 0x43f   : >> { %1978 = vst [vmem:[%s2921_s20 + $0x70] sm:$0xff] %v1977_v48  ;;  %v1983_v51 = vld [vmem:[%s2925_s25 + $0x88] sm:$0xff]  ;;  %1980 = vst [vmem:[%s2921_s20 + $0x78] sm:$0xff] %v1979_v49  ;;  %v1985_v52 = vld [vmem:[%s2925_s25 + $0x90] sm:$0xff] }
 0x440   : >> { %1982 = vst [vmem:[%s2921_s20 + $0x80] sm:$0xff] %v1981_v50  ;;  %1984 = vst [vmem:[%s2921_s20 + $0x88] sm:$0xff] %v1983_v51  ;;  %v1987_v53 = vld [vmem:[%s2925_s25 + $0x98] sm:$0xff]  ;;  %v1989_v54 = vld [vmem:[%s2925_s25 + $0xa0] sm:$0xff] }
 0x441   : >> { %1986 = vst [vmem:[%s2921_s20 + $0x90] sm:$0xff] %v1985_v52  ;;  %1988 = vst [vmem:[%s2921_s20 + $0x98] sm:$0xff] %v1987_v53  ;;  %v1991_v55 = vld [vmem:[%s2925_s25 + $0xa8] sm:$0xff]  ;;  %v1993_v56 = vld [vmem:[%s2925_s25 + $0xb0] sm:$0xff]  ;;  %1945 = sbr.rel (!%p1942_p12) target bundleno = 1079 (0x437), region = 160 }
 0x442   : >> { %1990 = vst [vmem:[%s2921_s20 + $0xa0] sm:$0xff] %v1989_v54  ;;  %v1995_v57 = vld [vmem:[%s2925_s25 + $0xb8] sm:$0xff]  ;;  %1992 = vst [vmem:[%s2921_s20 + $0xa8] sm:$0xff] %v1991_v55  ;;  %v1997_v58 = vld [vmem:[%s2925_s25 + $0xc0] sm:$0xff] }
 0x443   : >> { %1994 = vst [vmem:[%s2921_s20 + $0xb0] sm:$0xff] %v1993_v56  ;;  %1996 = vst [vmem:[%s2921_s20 + $0xb8] sm:$0xff] %v1995_v57  ;;  %v1999_v59 = vld [vmem:[%s2925_s25 + $0xc8] sm:$0xff]  ;;  %v2001_v60 = vld [vmem:[%s2925_s25 + $0xd0] sm:$0xff] }
 0x444   : >> { %1998 = vst [vmem:[%s2921_s20 + $0xc0] sm:$0xff] %v1997_v58  ;;  %2000 = vst [vmem:[%s2921_s20 + $0xc8] sm:$0xff] %v1999_v59  ;;  %v2003_v61 = vld [vmem:[%s2925_s25 + $0xd8] sm:$0xff]  ;;  %v2005_v0 = vld [vmem:[%s2925_s25 + $0xe0] sm:$0xff] }
 0x445   : >> { %2002 = vst [vmem:[%s2921_s20 + $0xd0] sm:$0xff] %v2001_v60  ;;  %v2007_v62 = vld [vmem:[%s2925_s25 + $0xe8] sm:$0xff]  ;;  %2004 = vst [vmem:[%s2921_s20 + $0xd8] sm:$0xff] %v2003_v61  ;;  %v2009_v63 = vld [vmem:[%s2925_s25 + $0xf0] sm:$0xff] }
 0x446   : >> { %2006 = vst [vmem:[%s2921_s20 + $0xe0] sm:$0xff] %v2005_v0  ;;  %2008 = vst [vmem:[%s2921_s20 + $0xe8] sm:$0xff] %v2007_v62  ;;  %v2011_v3 = vld [vmem:[%s2925_s25 + $0xf8] sm:$0xff]  ;;  %s3690_s25 = smov %s3611_s28 }
 0x447   : >> { %2010 = vst [vmem:[%s2921_s20 + $0xf0] sm:$0xff] %v2009_v63  ;;  %2012 = vst [vmem:[%s2921_s20 + $0xf8] sm:$0xff] %v2011_v3  ;;  %s3689_s20 = smov %s2019_s29 }
 0x448 PF: > { %s3652_s12 = sand.u32 31, %s3696_s17   ;;  %s2345_s27 = sshll.u32 %s3544_s22, 8 }
 0x449   : > { %s2024_s14 = scalar_lea.vmem %s3435_s30, %s2345_s27 [#allocation2]   ;;  %s2026_s19 = scalar_lea.vmem %s3538_s15, %s2345_s27  }
 0x44a   : > { %p2339_p13 = scmp.le.s32.totalorder %s3652_s12, 0 }
 0x44b   : > { %s2935_s23 = smov (!%p2339_p13), %s2026_s19   ;;  %s2939_s28 = smov (!%p2339_p13), %s2024_s14  }
 0x44c   : > { %2129 = sbr.rel (%p2339_p13) target bundleno = 1117 (0x45d), region = 165  ;;  %s2943_s29 = smov (!%p2339_p13), 0  }
 0x44d   : > { %s2947_s16 = smov (!%p2339_p13), 0  }
 0x453 LB: >> { %v2036_v2 = vld [vmem:[%s2941_s28] sm:$0xff]  ;;  %s2038_s17 = sadd.s32 1, %s2945_s29  ;;  %s2030_s16 = sadd.s32 1, %s2949_s16   ;;  %s2949_s16 = sphi %s2947_s16, %s2030_s16   ;;  %s2945_s29 = sphi %s2943_s29, %s2944_s29   ;;  %s2941_s28 = sphi %s2939_s28, %s2043_s28   ;;  %s2937_s23 = sphi %s2935_s23, %s2044_s23  }
 0x454   : >> { %2037 = vst [vmem:[%s2937_s23] sm:$0xff] %v2036_v2  ;;  %p2039_p0 = scmp.ge.s32.totalorder %s2038_s17, %s3652_s12  ;;  %p2029_p1 = scmp.ge.s32.totalorder %s2030_s16, %s3652_s12 }
 0x456   : >> { %s3700_s17 = smov (%p2039_p0, %s2038_s17), 0  ;;  %2032 = sbr.rel (!%p2029_p1) target bundleno = 1107 (0x453), region = 171 }
 0x457   : >> { %s2340_s30 = sshll.u32 %s3700_s17, 3  ;;  %s2944_s29 = smov %s3700_s17  }
 0x458   : >> { %s2043_s28 = scalar_lea.vmem %s2024_s14, %s2340_s30 [#allocation2]   ;;  %s2044_s23 = scalar_lea.vmem %s2026_s19, %s2340_s30  }
 0x45d PF: > { %p18_p2 = scmp.ge.s32.totalorder %s3028_s21, 4   ;;  %s3692_s17 = smov %s2913_s18 }
 0x45e   : > { %s3693_s18 = smov %s3036_s24  ;;  %s3694_s19 = smov %s3028_s21 }
 0x45f   :  { %20 = sbr.rel (!%p18_p2) target bundleno = 2 (0x2), region = 182 }

</bundles_post_ra>
